<compile_context>
chip_gen: v6e
topology: v6e:2x2x1
jax: 0.10.0
libtpu: 0.0.40
codegen_flags: <defaults>
</compile_context>

<pallas_src>
from functools import partial

import jax
import jax.numpy as jnp
from jax.experimental import pallas as pl
from jax.experimental.pallas import tpu as pltpu


LANE = 128  # final output lane width (full vreg) for a dense store


# ---------------------------------------------------------------------------
# Fused Pallas kernel: whole NodeFlow forward (all blocks + NodeUpdates)
# ---------------------------------------------------------------------------
def fused_gcn_kernel(*refs, block_cfgs):
    """block_cfgs: tuple of (n_weight_chunks, use_relu, use_concat) per block.

    refs layout: [features] + [idx_0..idx_{L-1}]
                 + per block: [w_chunk_0..w_chunk_{n_w-1}, bias]
                 + [out_ref]
    """
    n_blocks = len(block_cfgs)
    pos = 0
    feat_ref = refs[pos]; pos += 1
    idx_refs = refs[pos:pos + n_blocks]; pos += n_blocks
    layer_refs = []
    for (n_w, _, _) in block_cfgs:
        ws = refs[pos:pos + n_w]; pos += n_w
        b = refs[pos]; pos += 1
        layer_refs.append((ws, b))
    out_ref = refs[pos]

    # node-layer 0 activation == features; activations carried as segments
    segs = [feat_ref[...].astype(jnp.float32)]

    for li, (n_w, use_relu, use_concat) in enumerate(block_cfgs):
        idx = idx_refs[li][...]                       # (n_dst, K) int32
        n_dst, K = idx.shape
        n_src = segs[0].shape[0]

        # mailbox mean == (1/K)-weighted one-hot adjacency (dups accumulate),
        # built fully in-register from the index table (no HBM adjacency).
        col = jax.lax.broadcasted_iota(jnp.int32, (n_dst, n_src), 1)
        hits = jnp.zeros((n_dst, n_src), jnp.float32)
        for k in range(K):                            # K small & static
            hits = hits + (idx[:, k:k + 1] == col).astype(jnp.float32)
        adj = (hits * (1.0 / K)).astype(jnp.bfloat16)

        ws, b_ref = layer_refs[li]
        f_out = ws[0].shape[1]
        acc = jnp.zeros((n_dst, f_out), jnp.float32)
        for seg, w_ref in zip(segs, ws):
            w16 = w_ref[...].astype(jnp.bfloat16)
            s16 = seg.astype(jnp.bfloat16)
            f_in = seg.shape[1]
            # static matmul-order choice (associativity): (A@H)@W vs A@(H@W)
            cost_agg_first = n_dst * n_src * f_in + n_dst * f_in * f_out
            cost_lin_first = n_src * f_in * f_out + n_dst * n_src * f_out
            if cost_lin_first < cost_agg_first:
                hw = jnp.dot(s16, w16, preferred_element_type=jnp.float32)
                acc = acc + jnp.dot(adj, hw.astype(jnp.bfloat16),
                                    preferred_element_type=jnp.float32)
            else:
                ah = jnp.dot(adj, s16, preferred_element_type=jnp.float32)
                acc = acc + jnp.dot(ah.astype(jnp.bfloat16), w16,
                                    preferred_element_type=jnp.float32)
        lin = acc + b_ref[...]                        # bias / ReLU in f32

        if use_concat:
            # NodeUpdate(concat=True): cat((h, relu(h)), dim=1) carried as two
            # segments; next layer row-splits its weight (no lane concat).
            segs = [lin, jnp.maximum(lin, 0.0)]
        elif use_relu:
            segs = [jnp.maximum(lin, 0.0)]
        else:
            segs = [lin]

    # GCNSampling's last NodeUpdate is concat=False -> single segment whose
    # lane dim was padded to LANE via the padded final weight: dense store.
    out_ref[...] = segs[0].astype(out_ref.dtype)


# ---------------------------------------------------------------------------
# Parameter setup + forward wrapper (glue in plain JAX)
# ---------------------------------------------------------------------------
def init_gcn_params(key, in_feats, n_hidden, n_classes, n_layers):
    """Mirror GCNSampling.__init__ layer stack (activation = ReLU)."""
    layer_defs = []
    skip_start = (0 == n_layers - 1)
    layer_defs.append((in_feats, n_hidden, True, skip_start))
    for i in range(1, n_layers):
        skip_start = (i == n_layers - 1)
        layer_defs.append((n_hidden, n_hidden, True, skip_start))
    layer_defs.append((2 * n_hidden, n_classes, False, False))

    params = []
    for fi, fo, act, cat in layer_defs:
        key, kw, kb = jax.random.split(key, 3)
        bound = 1.0 / float(fi) ** 0.5
        w = jax.random.uniform(kw, (fi, fo), jnp.float32, -bound, bound)
        b = jax.random.uniform(kb, (fo,), jnp.float32, -bound, bound)
        params.append({"w": w, "b": b, "act": act, "concat": cat})
    return params


def _build_fused_args(params, features, nbr_indices):
    """Flatten all kernel inputs: row-split weights per input segment (so the
    kernel never concatenates along lanes) and pad the final out-dim to a full
    128-lane vreg for a dense output store."""
    args = [features] + list(nbr_indices)
    cfgs = []
    seg_widths = [features.shape[1]]
    n_blocks = len(params)
    for li, p in enumerate(params):
        w, b = p["w"], p["b"]
        if li == n_blocks - 1:
            assert w.shape[1] <= LANE
            pad = LANE - w.shape[1]
            w = jnp.pad(w, ((0, 0), (0, pad)))
            b = jnp.pad(b, ((0, pad),))
        off = 0
        for sw in seg_widths:
            args.append(w[off:off + sw, :].astype(jnp.bfloat16))
            off += sw
        args.append(b.reshape(1, -1).astype(jnp.float32))
        cfgs.append((len(seg_widths), bool(p["act"]), bool(p["concat"])))
        f_out = p["w"].shape[1]
        seg_widths = [f_out, f_out] if p["concat"] else [f_out]
    return args, tuple(cfgs)


def gcn_sampling_forward(params, features, nbr_indices, layer_sizes):
    """Fused NodeFlow forward: one pallas_call covers all blocks."""
    # TODO(synk): dropout>0 would need pltpu.prng_* inside the kernel; this
    # GCNSampling instance uses dropout=0 (self.dropout is None), so exact.
    args, cfgs = _build_fused_args(params, features, nbr_indices)
    n_classes = params[-1]["w"].shape[1]
    n_dst_last = layer_sizes[-1]

    out_padded = pl.pallas_call(
        partial(fused_gcn_kernel, block_cfgs=cfgs),
        out_shape=jax.ShapeDtypeStruct((n_dst_last, LANE), jnp.float32),
        grid=(1,),
        in_specs=[pl.BlockSpec(a.shape, lambda i: (0, 0)) for a in args],
        out_specs=pl.BlockSpec((n_dst_last, LANE), lambda i: (0, 0)),
        compiler_params=pltpu.CompilerParams(
            dimension_semantics=("arbitrary",),
            vmem_limit_bytes=32 * 1024 * 1024,
        ),
    )(*args)
    return out_padded[:, :n_classes]


# ---------------------------------------------------------------------------
if __name__ == "__main__":
    in_feats, n_hidden, n_classes, n_layers = 32, 32, 8, 2
    K = 4  # sampled neighbors per destination node
    # NodeFlow has n_layers + 2 node layers and n_layers + 1 blocks.
    layer_sizes = [64, 32, 16, 8]

    key = jax.random.PRNGKey(0)
    key, kf = jax.random.split(key)
    features = jax.random.normal(kf, (layer_sizes[0], in_feats), jnp.float32)

    nbr_indices = []
    for i in range(len(layer_sizes) - 1):
        key, ki = jax.random.split(key)
        nbr_indices.append(
            jax.random.randint(ki, (layer_sizes[i + 1], K), 0, layer_sizes[i],
                               dtype=jnp.int32))

    key, kp = jax.random.split(key)
    params = init_gcn_params(kp, in_feats, n_hidden, n_classes, n_layers)

    out = gcn_sampling_forward(params, features, nbr_indices, layer_sizes)
    out = jax.block_until_ready(out)
    assert out.shape == (layer_sizes[-1], n_classes), out.shape
    assert bool(jnp.all(jnp.isfinite(out)))
    print("KERNEL_OK")
</pallas_src>

<mosaic_0001>
module attributes {stable_mosaic.version = 11 : i64} {
  func.func @fused_gcn_kernel(%arg0: i32, %arg1: memref<64x32xf32, #tpu.memory_space<vmem>>, %arg2: memref<32x4xi32, #tpu.memory_space<vmem>>, %arg3: memref<16x4xi32, #tpu.memory_space<vmem>>, %arg4: memref<8x4xi32, #tpu.memory_space<vmem>>, %arg5: memref<32x32xbf16, #tpu.memory_space<vmem>>, %arg6: memref<1x32xf32, #tpu.memory_space<vmem>>, %arg7: memref<32x32xbf16, #tpu.memory_space<vmem>>, %arg8: memref<1x32xf32, #tpu.memory_space<vmem>>, %arg9: memref<32x128xbf16, #tpu.memory_space<vmem>>, %arg10: memref<32x128xbf16, #tpu.memory_space<vmem>>, %arg11: memref<1x128xf32, #tpu.memory_space<vmem>>, %arg12: memref<8x128xf32, #tpu.memory_space<vmem>>) attributes {dimension_semantics = [#tpu.dimension_semantics<arbitrary>], iteration_bounds = array<i64: 1>, scalar_prefetch = 0 : i64, scratch_operands = 0 : i64, tpu.core_type = #tpu.core_type<tc>, window_params = [{pipeline_mode = #tpu.pipeline_mode<synchronous>, transform_indices = @transform_0, window_bounds = array<i64: 64, 32>}, {pipeline_mode = #tpu.pipeline_mode<synchronous>, transform_indices = @transform_1, window_bounds = array<i64: 32, 4>}, {pipeline_mode = #tpu.pipeline_mode<synchronous>, transform_indices = @transform_2, window_bounds = array<i64: 16, 4>}, {pipeline_mode = #tpu.pipeline_mode<synchronous>, transform_indices = @transform_3, window_bounds = array<i64: 8, 4>}, {pipeline_mode = #tpu.pipeline_mode<synchronous>, transform_indices = @transform_4, window_bounds = array<i64: 32, 32>}, {pipeline_mode = #tpu.pipeline_mode<synchronous>, transform_indices = @transform_5, window_bounds = array<i64: 1, 32>}, {pipeline_mode = #tpu.pipeline_mode<synchronous>, transform_indices = @transform_6, window_bounds = array<i64: 32, 32>}, {pipeline_mode = #tpu.pipeline_mode<synchronous>, transform_indices = @transform_7, window_bounds = array<i64: 1, 32>}, {pipeline_mode = #tpu.pipeline_mode<synchronous>, transform_indices = @transform_8, window_bounds = array<i64: 32, 128>}, {pipeline_mode = #tpu.pipeline_mode<synchronous>, transform_indices = @transform_9, window_bounds = array<i64: 32, 128>}, {pipeline_mode = #tpu.pipeline_mode<synchronous>, transform_indices = @transform_10, window_bounds = array<i64: 1, 128>}, {pipeline_mode = #tpu.pipeline_mode<synchronous>, transform_indices = @transform_11, window_bounds = array<i64: 8, 128>}]} {
    %c0 = arith.constant 0 : index
    %c0_0 = arith.constant 0 : index
    %0 = vector.load %arg1[%c0, %c0_0] : memref<64x32xf32, #tpu.memory_space<vmem>>, vector<64x32xf32>
    %c0_1 = arith.constant 0 : index
    %c0_2 = arith.constant 0 : index
    %1 = vector.load %arg2[%c0_1, %c0_2] : memref<32x4xi32, #tpu.memory_space<vmem>>, vector<32x4xi32>
    %2 = tpu.iota {dimensions = array<i32: 1>} : vector<32x64xi32>
    %cst = arith.constant 0.000000e+00 : f32
    %3 = vector.broadcast %cst : f32 to vector<32x64xf32>
    %4 = vector.extract_strided_slice %1 {offsets = [0, 0], sizes = [32, 1], strides = [1, 1]} : vector<32x4xi32> to vector<32x1xi32>
    %5 = vector.broadcast %4 : vector<32x1xi32> to vector<32x64xi32>
    %6 = arith.cmpi eq, %5, %2 : vector<32x64xi32>
    %7 = arith.extui %6 : vector<32x64xi1> to vector<32x64xi32>
    %8 = arith.sitofp %7 : vector<32x64xi32> to vector<32x64xf32>
    %9 = arith.addf %3, %8 : vector<32x64xf32>
    %10 = vector.extract_strided_slice %1 {offsets = [0, 1], sizes = [32, 1], strides = [1, 1]} : vector<32x4xi32> to vector<32x1xi32>
    %11 = vector.broadcast %10 : vector<32x1xi32> to vector<32x64xi32>
    %12 = arith.cmpi eq, %11, %2 : vector<32x64xi32>
    %13 = arith.extui %12 : vector<32x64xi1> to vector<32x64xi32>
    %14 = arith.sitofp %13 : vector<32x64xi32> to vector<32x64xf32>
    %15 = arith.addf %9, %14 : vector<32x64xf32>
    %16 = vector.extract_strided_slice %1 {offsets = [0, 2], sizes = [32, 1], strides = [1, 1]} : vector<32x4xi32> to vector<32x1xi32>
    %17 = vector.broadcast %16 : vector<32x1xi32> to vector<32x64xi32>
    %18 = arith.cmpi eq, %17, %2 : vector<32x64xi32>
    %19 = arith.extui %18 : vector<32x64xi1> to vector<32x64xi32>
    %20 = arith.sitofp %19 : vector<32x64xi32> to vector<32x64xf32>
    %21 = arith.addf %15, %20 : vector<32x64xf32>
    %22 = vector.extract_strided_slice %1 {offsets = [0, 3], sizes = [32, 1], strides = [1, 1]} : vector<32x4xi32> to vector<32x1xi32>
    %23 = vector.broadcast %22 : vector<32x1xi32> to vector<32x64xi32>
    %24 = arith.cmpi eq, %23, %2 : vector<32x64xi32>
    %25 = arith.extui %24 : vector<32x64xi1> to vector<32x64xi32>
    %26 = arith.sitofp %25 : vector<32x64xi32> to vector<32x64xf32>
    %27 = arith.addf %21, %26 : vector<32x64xf32>
    %cst_3 = arith.constant 2.500000e-01 : f32
    %28 = vector.broadcast %cst_3 : f32 to vector<32x64xf32>
    %29 = arith.mulf %27, %28 : vector<32x64xf32>
    %30 = arith.truncf %29 : vector<32x64xf32> to vector<32x64xbf16>
    %cst_4 = arith.constant 0.000000e+00 : f32
    %31 = vector.broadcast %cst_4 : f32 to vector<32x32xf32>
    %c0_5 = arith.constant 0 : index
    %c0_6 = arith.constant 0 : index
    %32 = vector.load %arg5[%c0_5, %c0_6] : memref<32x32xbf16, #tpu.memory_space<vmem>>, vector<32x32xbf16>
    %33 = arith.truncf %0 : vector<64x32xf32> to vector<64x32xbf16>
    %cst_7 = arith.constant dense<0.000000e+00> : vector<32x32xf32>
    %34 = tpu.matmul %30, %33, %cst_7 {dimension_numbers = #tpu.dot_dimension_numbers<[1], [0], [0], [1], [0, 0, 1, 1], [], []>} : vector<32x64xbf16>, vector<64x32xbf16>, vector<32x32xf32> -> vector<32x32xf32>
    %35 = arith.truncf %34 : vector<32x32xf32> to vector<32x32xbf16>
    %cst_8 = arith.constant dense<0.000000e+00> : vector<32x32xf32>
    %36 = tpu.matmul %35, %32, %cst_8 {dimension_numbers = #tpu.dot_dimension_numbers<[1], [0], [0], [1], [0, 0, 1, 1], [], []>} : vector<32x32xbf16>, vector<32x32xbf16>, vector<32x32xf32> -> vector<32x32xf32>
    %37 = arith.addf %31, %36 : vector<32x32xf32>
    %c0_9 = arith.constant 0 : index
    %c0_10 = arith.constant 0 : index
    %38 = vector.load %arg6[%c0_9, %c0_10] : memref<1x32xf32, #tpu.memory_space<vmem>>, vector<1x32xf32>
    %39 = vector.broadcast %38 : vector<1x32xf32> to vector<32x32xf32>
    %40 = arith.addf %37, %39 : vector<32x32xf32>
    %cst_11 = arith.constant 0.000000e+00 : f32
    %41 = vector.broadcast %cst_11 : f32 to vector<32x32xf32>
    %42 = arith.maximumf %40, %41 : vector<32x32xf32>
    %c0_12 = arith.constant 0 : index
    %c0_13 = arith.constant 0 : index
    %43 = vector.load %arg3[%c0_12, %c0_13] : memref<16x4xi32, #tpu.memory_space<vmem>>, vector<16x4xi32>
    %44 = tpu.iota {dimensions = array<i32: 1>} : vector<16x32xi32>
    %cst_14 = arith.constant 0.000000e+00 : f32
    %45 = vector.broadcast %cst_14 : f32 to vector<16x32xf32>
    %46 = vector.extract_strided_slice %43 {offsets = [0, 0], sizes = [16, 1], strides = [1, 1]} : vector<16x4xi32> to vector<16x1xi32>
    %47 = vector.broadcast %46 : vector<16x1xi32> to vector<16x32xi32>
    %48 = arith.cmpi eq, %47, %44 : vector<16x32xi32>
    %49 = arith.extui %48 : vector<16x32xi1> to vector<16x32xi32>
    %50 = arith.sitofp %49 : vector<16x32xi32> to vector<16x32xf32>
    %51 = arith.addf %45, %50 : vector<16x32xf32>
    %52 = vector.extract_strided_slice %43 {offsets = [0, 1], sizes = [16, 1], strides = [1, 1]} : vector<16x4xi32> to vector<16x1xi32>
    %53 = vector.broadcast %52 : vector<16x1xi32> to vector<16x32xi32>
    %54 = arith.cmpi eq, %53, %44 : vector<16x32xi32>
    %55 = arith.extui %54 : vector<16x32xi1> to vector<16x32xi32>
    %56 = arith.sitofp %55 : vector<16x32xi32> to vector<16x32xf32>
    %57 = arith.addf %51, %56 : vector<16x32xf32>
    %58 = vector.extract_strided_slice %43 {offsets = [0, 2], sizes = [16, 1], strides = [1, 1]} : vector<16x4xi32> to vector<16x1xi32>
    %59 = vector.broadcast %58 : vector<16x1xi32> to vector<16x32xi32>
    %60 = arith.cmpi eq, %59, %44 : vector<16x32xi32>
    %61 = arith.extui %60 : vector<16x32xi1> to vector<16x32xi32>
    %62 = arith.sitofp %61 : vector<16x32xi32> to vector<16x32xf32>
    %63 = arith.addf %57, %62 : vector<16x32xf32>
    %64 = vector.extract_strided_slice %43 {offsets = [0, 3], sizes = [16, 1], strides = [1, 1]} : vector<16x4xi32> to vector<16x1xi32>
    %65 = vector.broadcast %64 : vector<16x1xi32> to vector<16x32xi32>
    %66 = arith.cmpi eq, %65, %44 : vector<16x32xi32>
    %67 = arith.extui %66 : vector<16x32xi1> to vector<16x32xi32>
    %68 = arith.sitofp %67 : vector<16x32xi32> to vector<16x32xf32>
    %69 = arith.addf %63, %68 : vector<16x32xf32>
    %cst_15 = arith.constant 2.500000e-01 : f32
    %70 = vector.broadcast %cst_15 : f32 to vector<16x32xf32>
    %71 = arith.mulf %69, %70 : vector<16x32xf32>
    %72 = arith.truncf %71 : vector<16x32xf32> to vector<16x32xbf16>
    %cst_16 = arith.constant 0.000000e+00 : f32
    %73 = vector.broadcast %cst_16 : f32 to vector<16x32xf32>
    %c0_17 = arith.constant 0 : index
    %c0_18 = arith.constant 0 : index
    %74 = vector.load %arg7[%c0_17, %c0_18] : memref<32x32xbf16, #tpu.memory_space<vmem>>, vector<32x32xbf16>
    %75 = arith.truncf %42 : vector<32x32xf32> to vector<32x32xbf16>
    %cst_19 = arith.constant dense<0.000000e+00> : vector<16x32xf32>
    %76 = tpu.matmul %72, %75, %cst_19 {dimension_numbers = #tpu.dot_dimension_numbers<[1], [0], [0], [1], [0, 0, 1, 1], [], []>} : vector<16x32xbf16>, vector<32x32xbf16>, vector<16x32xf32> -> vector<16x32xf32>
    %77 = arith.truncf %76 : vector<16x32xf32> to vector<16x32xbf16>
    %cst_20 = arith.constant dense<0.000000e+00> : vector<16x32xf32>
    %78 = tpu.matmul %77, %74, %cst_20 {dimension_numbers = #tpu.dot_dimension_numbers<[1], [0], [0], [1], [0, 0, 1, 1], [], []>} : vector<16x32xbf16>, vector<32x32xbf16>, vector<16x32xf32> -> vector<16x32xf32>
    %79 = arith.addf %73, %78 : vector<16x32xf32>
    %c0_21 = arith.constant 0 : index
    %c0_22 = arith.constant 0 : index
    %80 = vector.load %arg8[%c0_21, %c0_22] : memref<1x32xf32, #tpu.memory_space<vmem>>, vector<1x32xf32>
    %81 = vector.broadcast %80 : vector<1x32xf32> to vector<16x32xf32>
    %82 = arith.addf %79, %81 : vector<16x32xf32>
    %cst_23 = arith.constant 0.000000e+00 : f32
    %83 = vector.broadcast %cst_23 : f32 to vector<16x32xf32>
    %84 = arith.maximumf %82, %83 : vector<16x32xf32>
    %c0_24 = arith.constant 0 : index
    %c0_25 = arith.constant 0 : index
    %85 = vector.load %arg4[%c0_24, %c0_25] : memref<8x4xi32, #tpu.memory_space<vmem>>, vector<8x4xi32>
    %86 = tpu.iota {dimensions = array<i32: 1>} : vector<8x16xi32>
    %cst_26 = arith.constant 0.000000e+00 : f32
    %87 = vector.broadcast %cst_26 : f32 to vector<8x16xf32>
    %88 = vector.extract_strided_slice %85 {offsets = [0, 0], sizes = [8, 1], strides = [1, 1]} : vector<8x4xi32> to vector<8x1xi32>
    %89 = vector.broadcast %88 : vector<8x1xi32> to vector<8x16xi32>
    %90 = arith.cmpi eq, %89, %86 : vector<8x16xi32>
    %91 = arith.extui %90 : vector<8x16xi1> to vector<8x16xi32>
    %92 = arith.sitofp %91 : vector<8x16xi32> to vector<8x16xf32>
    %93 = arith.addf %87, %92 : vector<8x16xf32>
    %94 = vector.extract_strided_slice %85 {offsets = [0, 1], sizes = [8, 1], strides = [1, 1]} : vector<8x4xi32> to vector<8x1xi32>
    %95 = vector.broadcast %94 : vector<8x1xi32> to vector<8x16xi32>
    %96 = arith.cmpi eq, %95, %86 : vector<8x16xi32>
    %97 = arith.extui %96 : vector<8x16xi1> to vector<8x16xi32>
    %98 = arith.sitofp %97 : vector<8x16xi32> to vector<8x16xf32>
    %99 = arith.addf %93, %98 : vector<8x16xf32>
    %100 = vector.extract_strided_slice %85 {offsets = [0, 2], sizes = [8, 1], strides = [1, 1]} : vector<8x4xi32> to vector<8x1xi32>
    %101 = vector.broadcast %100 : vector<8x1xi32> to vector<8x16xi32>
    %102 = arith.cmpi eq, %101, %86 : vector<8x16xi32>
    %103 = arith.extui %102 : vector<8x16xi1> to vector<8x16xi32>
    %104 = arith.sitofp %103 : vector<8x16xi32> to vector<8x16xf32>
    %105 = arith.addf %99, %104 : vector<8x16xf32>
    %106 = vector.extract_strided_slice %85 {offsets = [0, 3], sizes = [8, 1], strides = [1, 1]} : vector<8x4xi32> to vector<8x1xi32>
    %107 = vector.broadcast %106 : vector<8x1xi32> to vector<8x16xi32>
    %108 = arith.cmpi eq, %107, %86 : vector<8x16xi32>
    %109 = arith.extui %108 : vector<8x16xi1> to vector<8x16xi32>
    %110 = arith.sitofp %109 : vector<8x16xi32> to vector<8x16xf32>
    %111 = arith.addf %105, %110 : vector<8x16xf32>
    %cst_27 = arith.constant 2.500000e-01 : f32
    %112 = vector.broadcast %cst_27 : f32 to vector<8x16xf32>
    %113 = arith.mulf %111, %112 : vector<8x16xf32>
    %114 = arith.truncf %113 : vector<8x16xf32> to vector<8x16xbf16>
    %cst_28 = arith.constant 0.000000e+00 : f32
    %115 = vector.broadcast %cst_28 : f32 to vector<8x128xf32>
    %c0_29 = arith.constant 0 : index
    %c0_30 = arith.constant 0 : index
    %116 = vector.load %arg9[%c0_29, %c0_30] : memref<32x128xbf16, #tpu.memory_space<vmem>>, vector<32x128xbf16>
    %117 = arith.truncf %82 : vector<16x32xf32> to vector<16x32xbf16>
    %cst_31 = arith.constant dense<0.000000e+00> : vector<8x32xf32>
    %118 = tpu.matmul %114, %117, %cst_31 {dimension_numbers = #tpu.dot_dimension_numbers<[1], [0], [0], [1], [0, 0, 1, 1], [], []>} : vector<8x16xbf16>, vector<16x32xbf16>, vector<8x32xf32> -> vector<8x32xf32>
    %119 = arith.truncf %118 : vector<8x32xf32> to vector<8x32xbf16>
    %cst_32 = arith.constant dense<0.000000e+00> : vector<8x128xf32>
    %120 = tpu.matmul %119, %116, %cst_32 {dimension_numbers = #tpu.dot_dimension_numbers<[1], [0], [0], [1], [0, 0, 1, 1], [], []>} : vector<8x32xbf16>, vector<32x128xbf16>, vector<8x128xf32> -> vector<8x128xf32>
    %121 = arith.addf %115, %120 : vector<8x128xf32>
    %c0_33 = arith.constant 0 : index
    %c0_34 = arith.constant 0 : index
    %122 = vector.load %arg10[%c0_33, %c0_34] : memref<32x128xbf16, #tpu.memory_space<vmem>>, vector<32x128xbf16>
    %123 = arith.truncf %84 : vector<16x32xf32> to vector<16x32xbf16>
    %cst_35 = arith.constant dense<0.000000e+00> : vector<8x32xf32>
    %124 = tpu.matmul %114, %123, %cst_35 {dimension_numbers = #tpu.dot_dimension_numbers<[1], [0], [0], [1], [0, 0, 1, 1], [], []>} : vector<8x16xbf16>, vector<16x32xbf16>, vector<8x32xf32> -> vector<8x32xf32>
    %125 = arith.truncf %124 : vector<8x32xf32> to vector<8x32xbf16>
    %cst_36 = arith.constant dense<0.000000e+00> : vector<8x128xf32>
    %126 = tpu.matmul %125, %122, %cst_36 {dimension_numbers = #tpu.dot_dimension_numbers<[1], [0], [0], [1], [0, 0, 1, 1], [], []>} : vector<8x32xbf16>, vector<32x128xbf16>, vector<8x128xf32> -> vector<8x128xf32>
    %127 = arith.addf %121, %126 : vector<8x128xf32>
    %c0_37 = arith.constant 0 : index
    %c0_38 = arith.constant 0 : index
    %128 = vector.load %arg11[%c0_37, %c0_38] : memref<1x128xf32, #tpu.memory_space<vmem>>, vector<1x128xf32>
    %129 = vector.broadcast %128 : vector<1x128xf32> to vector<8x128xf32>
    %130 = arith.addf %127, %129 : vector<8x128xf32>
    %c0_39 = arith.constant 0 : index
    %c0_40 = arith.constant 0 : index
    %131 = vector.load %arg12[%c0_39, %c0_40] : memref<8x128xf32, #tpu.memory_space<vmem>>, vector<8x128xf32>
    tpu.vector_store %arg12[%c0_39, %c0_40], %130 {strides = array<i32>} : memref<8x128xf32, #tpu.memory_space<vmem>>, vector<8x128xf32>,
    return
  }
  func.func @transform_0(%arg0: i32) -> (i32, i32) {
    %c0_i32 = arith.constant 0 : i32
    %c0_i32_0 = arith.constant 0 : i32
    %c0_i32_1 = arith.constant 0 : i32
    return %c0_i32, %c0_i32_0 : i32, i32
  }
  func.func @transform_1(%arg0: i32) -> (i32, i32) {
    %c0_i32 = arith.constant 0 : i32
    %c0_i32_0 = arith.constant 0 : i32
    %c0_i32_1 = arith.constant 0 : i32
    return %c0_i32, %c0_i32_0 : i32, i32
  }
  func.func @transform_2(%arg0: i32) -> (i32, i32) {
    %c0_i32 = arith.constant 0 : i32
    %c0_i32_0 = arith.constant 0 : i32
    %c0_i32_1 = arith.constant 0 : i32
    return %c0_i32, %c0_i32_0 : i32, i32
  }
  func.func @transform_3(%arg0: i32) -> (i32, i32) {
    %c0_i32 = arith.constant 0 : i32
    %c0_i32_0 = arith.constant 0 : i32
    %c0_i32_1 = arith.constant 0 : i32
    return %c0_i32, %c0_i32_0 : i32, i32
  }
  func.func @transform_4(%arg0: i32) -> (i32, i32) {
    %c0_i32 = arith.constant 0 : i32
    %c0_i32_0 = arith.constant 0 : i32
    %c0_i32_1 = arith.constant 0 : i32
    return %c0_i32, %c0_i32_0 : i32, i32
  }
  func.func @transform_5(%arg0: i32) -> (i32, i32) {
    %c0_i32 = arith.constant 0 : i32
    %c0_i32_0 = arith.constant 0 : i32
    %c0_i32_1 = arith.constant 0 : i32
    return %c0_i32, %c0_i32_0 : i32, i32
  }
  func.func @transform_6(%arg0: i32) -> (i32, i32) {
    %c0_i32 = arith.constant 0 : i32
    %c0_i32_0 = arith.constant 0 : i32
    %c0_i32_1 = arith.constant 0 : i32
    return %c0_i32, %c0_i32_0 : i32, i32
  }
  func.func @transform_7(%arg0: i32) -> (i32, i32) {
    %c0_i32 = arith.constant 0 : i32
    %c0_i32_0 = arith.constant 0 : i32
    %c0_i32_1 = arith.constant 0 : i32
    return %c0_i32, %c0_i32_0 : i32, i32
  }
  func.func @transform_8(%arg0: i32) -> (i32, i32) {
    %c0_i32 = arith.constant 0 : i32
    %c0_i32_0 = arith.constant 0 : i32
    %c0_i32_1 = arith.constant 0 : i32
    return %c0_i32, %c0_i32_0 : i32, i32
  }
  func.func @transform_9(%arg0: i32) -> (i32, i32) {
    %c0_i32 = arith.constant 0 : i32
    %c0_i32_0 = arith.constant 0 : i32
    %c0_i32_1 = arith.constant 0 : i32
    return %c0_i32, %c0_i32_0 : i32, i32
  }
  func.func @transform_10(%arg0: i32) -> (i32, i32) {
    %c0_i32 = arith.constant 0 : i32
    %c0_i32_0 = arith.constant 0 : i32
    %c0_i32_1 = arith.constant 0 : i32
    return %c0_i32, %c0_i32_0 : i32, i32
  }
  func.func @transform_11(%arg0: i32) -> (i32, i32) {
    %c0_i32 = arith.constant 0 : i32
    %c0_i32_0 = arith.constant 0 : i32
    %c0_i32_1 = arith.constant 0 : i32
    return %c0_i32, %c0_i32_0 : i32, i32
  }
}

</mosaic_0001>

<bundles_post_ra>
// kernel: tpu_custom_call.1
= control target key start
LH: loop header
LB: loop body
LE: loop exit
PB: predicated region body
PF: predicated region fallthrough
CT: control target
= control target key end

     0   :  { %v951_v1 = vmov 1   ;;  %v952_v2 = vmov 0   ;;  %s1206_s0 = inlined_call_operand.vmem [shape: f32[64,32], index: 0, kind: input, shape index: {}]   ;;  %s1207_s1 = inlined_call_operand.vmem [shape: s32[32,4], index: 1, kind: input, shape index: {}]   ;;  %s1208_s2 = inlined_call_operand.vmem [shape: s32[16,4], index: 2, kind: input, shape index: {}]   ;;  %s1209_s3 = inlined_call_operand.vmem [shape: s32[8,4], index: 3, kind: input, shape index: {}]   ;;  %s1210_s4 = inlined_call_operand.vmem [shape: bf16[32,32], index: 4, kind: input, shape index: {}]   ;;  %s1211_s5 = inlined_call_operand.vmem [shape: f32[1,32], index: 5, kind: input, shape index: {}]   ;;  %s1212_s6 = inlined_call_operand.vmem [shape: bf16[32,32], index: 6, kind: input, shape index: {}]   ;;  %s1213_s7 = inlined_call_operand.vmem [shape: f32[1,32], index: 7, kind: input, shape index: {}]   ;;  %s1214_s8 = inlined_call_operand.vmem [shape: bf16[32,128], index: 8, kind: input, shape index: {}]   ;;  %s1215_s9 = inlined_call_operand.vmem [shape: bf16[32,128], index: 9, kind: input, shape index: {}]   ;;  %s1216_s10 = inlined_call_operand.vmem [shape: f32[1,128], index: 10, kind: input, shape index: {}]   ;;  %s1217_s11 = inlined_call_operand.hbm [shape: f32[8,128], index: 11, kind: output, shape index: {}]  }
   0x1   :  { %v48_v0 = vld [vmem:[%s1207_s1] sm:$0xff]  ;;  %901 = vset.pattern.permute.xlu1 %v951_v1  ;;  %900 = vset.pattern.permute.xlu0 %v952_v2  ;;  %v49_v3 = vld [vmem:[%s1207_s1 + $0x8] sm:$0xff]  ;;  %v50_v4 = vld [vmem:[%s1207_s1 + $0x10] sm:$0xff] }
   0x2   :  { %83 = vperm.xlu1 %901, %v48_v0   ;;  %55 = vperm.xlu0 %900, %v48_v0  }
   0x6   :  { %86 = vperm.xlu1 %901, %v49_v3   ;;  %58 = vperm.xlu0 %900, %v49_v3  }
   0x7   :  { %16 = vsyncpa [#allocation3], 0  ;;  %v51_v5 = vld [vmem:[%s1207_s1 + $0x18] sm:$0xff]  ;;  %v953_v6 = vmov 2   ;;  %v46_v7 = vld [vmem:[%s1206_s0 + $0x30] sm:$0xff]  ;;  %v954_v9 = vmov 3   ;;  %v52_v28 = vlaneseq }
   0x8   :  { %v47_v8 = vld [vmem:[%s1206_s0 + $0x38] sm:$0xff]  ;;  %v44_v11 = vld [vmem:[%s1206_s0 + $0x20] sm:$0xff]  ;;  %v45_v12 = vld [vmem:[%s1206_s0 + $0x28] sm:$0xff]  ;;  %v955_v20 = vmov 0.0   ;;  %s957_s20 = smov [#allocation2]  }
   0x9   :  { %v179_v10 = vpack.c.bf16 %v47_v8, %v46_v7  ;;  %v178_v13 = vpack.c.bf16 %v45_v12, %v44_v11  ;;  %v42_v14 = vld [vmem:[%s1206_s0 + $0x10] sm:$0xff]  ;;  %v43_v15 = vld [vmem:[%s1206_s0 + $0x18] sm:$0xff]  ;;  %v40_v17 = vld [vmem:[%s1206_s0] sm:$0xff]  ;;  %v1066_v30 = vand.u32 127, %v52_v28 }
   0xa   :  { %902 = vset.pattern.permute.xlu1 %v952_v2  ;;  %61 = vperm.xlu0 %900, %v50_v4   ;;  %v177_v16 = vpack.c.bf16 %v43_v15, %v42_v14  ;;  %v41_v18 = vld [vmem:[%s1206_s0 + $0x8] sm:$0xff]  ;;  %v922_v14 = vld [vmem:[%s1210_s4] sm:$0xff]   ;;  %s746_s0 = sshll.u32 %s957_s20, 4  ;;  %s747_s0 = int_to_ptr.vmem [resolvable:$true] %s746_s0 }
   0xb   :  { %64 = vperm.xlu1 %902, %v51_v5   ;;  %829 = vmatprep.subr.bf16.mxu0 %v179_v10  ;;  %v176_v19 = vpack.c.bf16 %v41_v18, %v40_v17  ;;  %v317_v15 = vld [vmem:[%s1208_s2] sm:$0xff]  ;;  %s929_s21 = scalar_lea.vmem %s747_s0, 128  ;;  %p934_p1 = scmp.lt.s32.totalorder %s747_s0, %s747_s0 }
   0xc   :  { %830 = vmatpush3.bf16.msra.mxu0 %v179_v10  ;;  %p930_p0 = scmp.ne.s32.totalorder %s747_s0, %s929_s21  ;;  %p935_p2 = scmp.lt.s32.totalorder %s929_s21, %s929_s21 }
   0xd   :  { %831 = vmatprep.subr.bf16.mxu0 %v178_v13 }
   0xe   :  { %903 = vset.pattern.permute.xlu0 %v951_v1  ;;  %p936_p3 = por %p935_p2, %p934_p1 }
   0xf   :  { %904 = vset.pattern.permute.xlu1 %v951_v1  ;;  %89 = vperm.xlu0 %903, %v50_v4  }
  0x10   :  { %92 = vperm.xlu1 %904, %v51_v5   ;;  %832 = vmatpush3.bf16.msra.mxu0 %v178_v13  ;;  %v921_v13 = vld [vmem:[%s1210_s4 + $0x8] sm:$0xff]   ;;  %p937_p4 = pnand %p936_p3, %p930_p0 }
  0x11   :  { %833 = vmatprep.subr.bf16.mxu0 %v177_v16  ;;  %841 = vmatprep.subr.bf16.mxu1 %v921_v13 }
  0x12   :  { %842 = vmatpush3.bf16.msra.mxu1 %v921_v13 }
  0x13   :  { %906 = vset.pattern.permute.xlu0 %v953_v6  ;;  %843 = vmatprep.subr.bf16.mxu1 %v922_v14 }
  0x14   :  { %905 = vset.pattern.permute.xlu1 %v953_v6  ;;  %114 = vperm.xlu0 %906, %v49_v3  }
  0x15   :  { %111 = vperm.xlu1 %905, %v48_v0   ;;  %834 = vmatpush3.bf16.msra.mxu0 %v177_v16  ;;  %v318_v16 = vld [vmem:[%s1208_s2 + $0x8] sm:$0xff] }
  0x16   :  { %835 = vmatprep.subr.bf16.mxu0 %v176_v19  ;;  %844 = vmatpush3.bf16.msra.mxu1 %v922_v14 }
  0x17   :  { %849 = vmatprep.subr.bf16.mxu1 %v955_v20 }
  0x18   :  { %907 = vset.pattern.permute.xlu0 %v954_v9 }
  0x19   :  { %117 = vperm.xlu1 %905, %v50_v4   ;;  %139 = vperm.xlu0 %907, %v48_v0  }
  0x1a   :  { %836 = vmatpush3.bf16.msra.mxu0 %v176_v19 }
  0x1b   :  { %857 = vmatprep.subr.bf16.mxu0 %v955_v20 }
  0x1d   :  { %120 = vperm.xlu1 %905, %v51_v5   ;;  %148 = vperm.xlu0 %907, %v51_v5  }
  0x21   :  { %908 = vset.pattern.permute.xlu1 %v954_v9  ;;  %910 = vset.pattern.permute.xlu0 %v952_v2 }
  0x22   :  { %142 = vperm.xlu1 %908, %v49_v3   ;;  %323 = vperm.xlu0 %910, %v318_v16  }
  0x26   :  { %145 = vperm.xlu1 %908, %v50_v4   ;;  %912 = vset.pattern.permute.xlu0 %v953_v6 }
  0x27   :  { %348 = vperm.xlu0 %912, %v317_v15  }
  0x2a   :  { %909 = vset.pattern.permute.xlu1 %v952_v2 }
  0x2b   :  { %320 = vperm.xlu1 %909, %v317_v15   ;;  %915 = vset.pattern.permute.xlu0 %v954_v9 }
  0x2c   :  { %365 = vperm.xlu0 %915, %v318_v16  }
  0x2f   :  { %911 = vset.pattern.permute.xlu1 %v951_v1 }
  0x30   :  { %334 = vperm.xlu1 %911, %v317_v15   ;;  %918 = vset.pattern.permute.xlu0 %v953_v6 }
  0x34   :  { %337 = vperm.xlu1 %911, %v318_v16  }
  0x38   :  { %913 = vset.pattern.permute.xlu1 %v953_v6 }
  0x39   :  { %351 = vperm.xlu1 %913, %v318_v16  }
  0x3d   :  { %914 = vset.pattern.permute.xlu1 %v954_v9 }
  0x3e   :  { %362 = vperm.xlu1 %914, %v317_v15  }
  0x42   :  { %916 = vset.pattern.permute.xlu1 %v952_v2 }
  0x7d   :  { %v84_v21 = vpop.permute.xlu1 %83  ;;  %v56_v22 = vpop.permute.xlu0 %55 }
  0x7e   :  { %vm94_vm0 = vcmp.eq.s32.totalorder %v84_v21, %v1066_v30  ;;  %vm66_vm1 = vcmp.eq.s32.totalorder %v56_v22, %v1066_v30 }
  0x7f   :  { %v758_v35 = vsel %vm94_vm0, 1.0, %v955_v20  ;;  %v754_v36 = vsel %vm66_vm1, 1.0, %v955_v20  ;;  %vm180_vm0 = vcmask 523264   ;;  %vm257_vm1 = vcmask 261120  }
  0x80   :  { %v106_v43 = vadd.f32 %v758_v35, %v754_v36 }
  0x81   :  { %v87_v23 = vpop.permute.xlu1 %86  ;;  %v59_v24 = vpop.permute.xlu0 %58 }
  0x82   :  { %vm95_vm2 = vcmp.eq.s32.totalorder %v87_v23, %v1066_v30  ;;  %vm67_vm3 = vcmp.eq.s32.totalorder %v59_v24, %v1066_v30 }
  0x83   :  { %v759_v37 = vsel %vm95_vm2, 1.0, %v955_v20  ;;  %v755_v38 = vsel %vm67_vm3, 1.0, %v955_v20  ;;  %vm956_vm2 = vmmov 0  }
  0x84   :  { %v107_v44 = vadd.f32 %v759_v37, %v755_v38  ;;  %v772_v38 = vld [vmem:[%s1211_s5] ss:$0 sm:$0xff] }
  0x85   :  { %v62_v25 = vpop.permute.xlu0 %61 }
  0x86   :  { %v65_v26 = vpop.permute.xlu1 %64  ;;  %vm68_vm11 = vcmp.eq.s32.totalorder %v62_v25, %v1066_v30 }
  0x87   :  { %vm69_vm7 = vcmp.eq.s32.totalorder %v65_v26, %v1066_v30  ;;  %v756_v52 = vsel %vm68_vm11, 1.0, %v955_v20 }
  0x88   :  { %v757_v46 = vsel %vm69_vm7, 1.0, %v955_v20 }
  0x8a   :  { %v90_v27 = vpop.permute.xlu0 %89 }
  0x8b   :  { %v93_v29 = vpop.permute.xlu1 %92  ;;  %vm96_vm9 = vcmp.eq.s32.totalorder %v90_v27, %v1066_v30 }
  0x8c   :  { %vm97_vm4 = vcmp.eq.s32.totalorder %v93_v29, %v1066_v30  ;;  %v760_v49 = vsel %vm96_vm9, 1.0, %v955_v20 }
  0x8d   :  { %v761_v40 = vsel %vm97_vm4, 1.0, %v955_v20  ;;  %v108_v58 = vadd.f32 %v760_v49, %v756_v52 }
  0x8e   :  { %v109_v50 = vadd.f32 %v761_v40, %v757_v46 }
  0x8f   :  { %v115_v31 = vpop.permute.xlu0 %114 }
  0x90   :  { %v112_v32 = vpop.permute.xlu1 %111  ;;  %vm123_vm6 = vcmp.eq.s32.totalorder %v115_v31, %v1066_v30 }
  0x91   :  { %vm122_vm5 = vcmp.eq.s32.totalorder %v112_v32, %v1066_v30  ;;  %v763_v45 = vsel %vm123_vm6, 1.0, %v955_v20 }
  0x92   :  { %v762_v41 = vsel %vm122_vm5, 1.0, %v955_v20  ;;  %v135_v53 = vadd.f32 %v763_v45, %v107_v44 }
  0x93   :  { %v134_v51 = vadd.f32 %v762_v41, %v106_v43 }
  0x94   :  { %v118_v33 = vpop.permute.xlu1 %117  ;;  %v140_v34 = vpop.permute.xlu0 %139 }
  0x95   :  { %vm150_vm8 = vcmp.eq.s32.totalorder %v140_v34, %v1066_v30  ;;  %vm124_vm12 = vcmp.eq.s32.totalorder %v118_v33, %v1066_v30 }
  0x96   :  { %v766_v47 = vsel %vm150_vm8, 1.0, %v955_v20  ;;  %v764_v55 = vsel %vm124_vm12, 1.0, %v955_v20 }
  0x97   :  { %v162_v56 = vadd.f32 %v766_v47, %v134_v51  ;;  %v136_v62 = vadd.f32 %v764_v55, %v108_v58 }
  0x98   :  { %v121_v39 = vpop.permute.xlu1 %120  ;;  %v149_v42 = vpop.permute.xlu0 %148 }
  0x99   :  { %vm125_vm10 = vcmp.eq.s32.totalorder %v121_v39, %v1066_v30  ;;  %vm153_vm13 = vcmp.eq.s32.totalorder %v149_v42, %v1066_v30  ;;  %v166_v0 = vmul.f32 0.25, %v162_v56 }
  0x9a   :  { %v765_v48 = vsel %vm125_vm10, 1.0, %v955_v20  ;;  %v769_v59 = vsel %vm153_vm13, 1.0, %v955_v20 }
  0x9b   :  { %v137_v57 = vadd.f32 %v765_v48, %v109_v50 }
  0x9d   :  { %v143_v54 = vpop.permute.xlu1 %142  ;;  %v165_v3 = vadd.f32 %v769_v59, %v137_v57  ;;  %v324_v25 = vpop.permute.xlu0 %323 }
  0x9e   :  { %vm151_vm14 = vcmp.eq.s32.totalorder %v143_v54, %v1066_v30  ;;  %vm326_vm6 = vcmp.eq.s32.totalorder %v324_v25, %v1066_v30 }
  0x9f   :  { %v767_v60 = vsel %vm151_vm14, 1.0, %v955_v20  ;;  %v169_v10 = vmul.f32 0.25, %v165_v3  ;;  %v778_v32 = vsel %vm326_vm6, 1.0, %v955_v20  ;;  %v494_v3 = vld [vmem:[%s1209_s3] sm:$0xff] }
  0xa0   :  { %v163_v61 = vadd.f32 %v767_v60, %v135_v53  ;;  %496 = vperm.xlu1 %916, %v494_v3   ;;  %510 = vperm.xlu0 %918, %v494_v3  }
  0xa1   :  { %v146_v63 = vpop.permute.xlu1 %145 }
  0xa2   :  { %v167_v4 = vmul.f32 0.25, %v163_v61  ;;  %vm152_vm15 = vcmp.eq.s32.totalorder %v146_v63, %v1066_v30  ;;  %v349_v27 = vpop.permute.xlu0 %348  ;;  %v923_v63 = vld [vmem:[%s1212_s6 + $0x8] sm:$0xff]  }
  0xa3   :  { %v768_v5 = vsel %vm152_vm15, 1.0, %v955_v20  ;;  %vm353_vm8 = vcmp.eq.s32.totalorder %v349_v27, %v1066_v30  ;;  %vm530_vm15 = vcmask 130048  }
  0xa4   :  { %v164_v7 = vadd.f32 %v768_v5, %v136_v62  ;;  %v170_v8 = vpack.c.bf16 %v167_v4, %v166_v0  ;;  %v781_v40 = vsel %vm353_vm8, 1.0, %v955_v20  ;;  %v924_v0 = vld [vmem:[%s1212_s6] sm:$0xff]   ;;  %917 = vset.pattern.permute.xlu1 %v951_v1  ;;  %920 = vset.pattern.permute.xlu0 %v954_v9 }
  0xa5   :  { %503 = vperm.xlu1 %917, %v494_v3  }
  0xa6   :  { %v168_v11 = vmul.f32 0.25, %v164_v7  ;;  %837 = vmatprep.mubr.msk.bf16.mxu0 %vm180_vm0, %v170_v8  ;;  %v321_v6 = vpop.permute.xlu1 %320 }
  0xa7   :  { %vm325_vm3 = vcmp.eq.s32.totalorder %v321_v6, %v1066_v30  ;;  %v366_v34 = vpop.permute.xlu0 %365 }
  0xa8   :  { %v171_v12 = vpack.c.bf16 %v169_v10, %v168_v11  ;;  %v777_v28 = vsel %vm325_vm3, 1.0, %v955_v20  ;;  %vm368_vm10 = vcmp.eq.s32.totalorder %v366_v34, %v1066_v30  ;;  %v927_v34 = vld [vmem:[%s1214_s8] sm:$0xff]  }
  0xa9   :  { %v784_v47 = vsel %vm368_vm10, 1.0, %v955_v20  ;;  %919 = vset.pattern.permute.xlu1 %v954_v9 }
  0xaa   :  { %838 = vmatmul.mubr.msk.bf16.vlgmr.msra.gmra.mxu0 %vm180_vm0, %v171_v12  ;;  %517 = vperm.xlu1 %919, %v494_v3  }
  0xab   :  { %861 = vmatprep.mubr.msk.bf16.mxu0 %vm956_vm2, %v955_v20  ;;  %v335_v2 = vpop.permute.xlu1 %334  ;;  %858 = vmatpush3.bf16.msra.mxu0 %v923_v63 }
  0xac   :  { %vm339_vm4 = vcmp.eq.s32.totalorder %v335_v2, %v1066_v30  ;;  %859 = vmatprep.subr.bf16.mxu0 %v955_v20 }
  0xad   :  { %v779_v29 = vsel %vm339_vm4, 1.0, %v955_v20 }
  0xae   :  { %v345_v35 = vadd.f32 %v779_v29, %v777_v28 }
  0xaf   :  { %v338_v24 = vpop.permute.xlu1 %337  ;;  %860 = vmatpush3.bf16.msra.mxu0 %v924_v0 }
  0xb0   :  { %vm340_vm5 = vcmp.eq.s32.totalorder %v338_v24, %v1066_v30  ;;  %v359_v44 = vadd.f32 %v781_v40, %v345_v35  ;;  %871 = vmatprep.subr.bf16.mxu0 %v955_v20  ;;  %v928_v35 = vld [vmem:[%s1215_s9] sm:$0xff]  }
  0xb1   :  { %v780_v31 = vsel %vm340_vm5, 1.0, %v955_v20 }
  0xb2   :  { %v346_v36 = vadd.f32 %v780_v31, %v778_v32 }
  0xb4   :  { %v352_v26 = vpop.permute.xlu1 %351 }
  0xb5   :  { %vm354_vm7 = vcmp.eq.s32.totalorder %v352_v26, %v1066_v30 }
  0xb6   :  { %v782_v39 = vsel %vm354_vm7, 1.0, %v955_v20 }
  0xb7   :  { %v360_v43 = vadd.f32 %v782_v39, %v346_v36 }
  0xb9   :  { %v363_v33 = vpop.permute.xlu1 %362  ;;  %v374_v55 = vadd.f32 %v784_v47, %v360_v43 }
  0xba   :  { %vm367_vm9 = vcmp.eq.s32.totalorder %v363_v33, %v1066_v30  ;;  %v925_v33 = vld [vmem:[%s1214_s8 + $0x8] sm:$0xff]  }
  0xbb   :  { %v783_v46 = vsel %vm367_vm9, 1.0, %v955_v20  ;;  %v376_v60 = vmul.f32 0.25, %v374_v55 }
  0xbc   :  { %v373_v54 = vadd.f32 %v783_v46, %v359_v44 }
  0xbe   :  { %v375_v59 = vmul.f32 0.25, %v373_v54 }
  0xc0   :  { %v377_v62 = vpack.c.bf16 %v376_v60, %v375_v59 }
 0x11b   :  { %v497_v11 = vpop.permute.xlu1 %496  ;;  %v511_v1 = vpop.permute.xlu0 %510 }
 0x11c   :  { %vm498_vm11 = vcmp.eq.s32.totalorder %v497_v11, %v1066_v30  ;;  %vm512_vm13 = vcmp.eq.s32.totalorder %v511_v1, %v1066_v30 }
 0x11d   :  { %v790_v9 = vsel %vm498_vm11, 1.0, %v955_v20  ;;  %v792_v16 = vsel %vm512_vm13, 1.0, %v955_v20 }
 0x120   :  { %v504_v12 = vpop.permute.xlu1 %503 }
 0x121   :  { %vm505_vm12 = vcmp.eq.s32.totalorder %v504_v12, %v1066_v30 }
 0x122   :  { %v791_v13 = vsel %vm505_vm12, 1.0, %v955_v20 }
 0x123   :  { %v508_v15 = vadd.f32 %v791_v13, %v790_v9 }
 0x125   :  { %v518_v14 = vpop.permute.xlu1 %517 }
 0x126   :  { %vm519_vm14 = vcmp.eq.s32.totalorder %v518_v14, %v1066_v30  ;;  %v926_v30 = vld [vmem:[%s1215_s9 + $0x8] sm:$0xff]  }
 0x16a   :  { %v839_v17 = vpop.f32.mrf.mxu0 }
 0x16c   :  { %v221_v18 = vpop.f32.mrf.mxu0 }
 0x16e   :  { %v840_v19 = vpop.f32.mrf.mxu0 }
 0x16f   :  { %v237_v23 = vpack.c.bf16 %v840_v19, %v839_v17  ;;  %v515_v17 = vadd.f32 %v792_v16, %v508_v15  ;;  %v786_v19 = vld [vmem:[%s1213_s7] ss:$0 sm:$0xff] }
 0x170   :  { %v224_v21 = vpop.f32.mrf.mxu0 }
 0x171   :  { %v236_v22 = vpack.c.bf16 %v224_v21, %v221_v18  ;;  %v793_v18 = vsel %vm519_vm14, 1.0, %v955_v20 }
 0x173   :  { %845 = vmatprep.mubr.msk.bf16.mxu1 %vm257_vm1, %v236_v22 }
 0x174   :  { %846 = vmatmul.mubr.msk.bf16.vlgmr.msra.gmra.mxu1 %vm257_vm1, %v237_v23  ;;  %v522_v23 = vadd.f32 %v793_v18, %v515_v17 }
 0x175   :  { %853 = vmatprep.mubr.msk.bf16.mxu1 %vm956_vm2, %v955_v20 }
 0x176   :  { %v523_v25 = vmul.f32 0.25, %v522_v23 }
 0x178   :  { %v524_v32 = vpack.c.bf16 %v523_v25, %v523_v25 }
 0x234   :  { %v847_v37 = vpop.f32.mrf.mxu1 }
 0x235   :  { %v307_v42 = vadd.f32 %v847_v37, %v772_v38 }
 0x236   :  { %v298_v41 = vpop.f32.mrf.mxu1 }
 0x237   :  { %v315_v50 = vmax.f32 %v307_v42, 0.0  ;;  %v299_v51 = vadd.f32 %v772_v38, %v298_v41 }
 0x238   :  { %v848_v45 = vpop.f32.mrf.mxu1 }
 0x239   :  { %v310_v48 = vadd.f32 %v848_v45, %v772_v38  ;;  %v313_v58 = vmax.f32 %v299_v51, 0.0 }
 0x23a   :  { %v301_v49 = vpop.f32.mrf.mxu1 }
 0x23b   :  { %v316_v52 = vmax.f32 %v310_v48, 0.0  ;;  %v302_v53 = vadd.f32 %v772_v38, %v301_v49  ;;  %v802_v48 = vld [vmem:[%s1216_s10] ss:$0 sm:$0xff] }
 0x23d   :  { %v383_v56 = vpack.c.bf16 %v316_v52, %v315_v50  ;;  %v314_v57 = vmax.f32 %v302_v53, 0.0 }
 0x23f   :  { %850 = vmatpush3.bf16.msra.mxu1 %v383_v56  ;;  %v382_v61 = vpack.c.bf16 %v314_v57, %v313_v58 }
 0x240   :  { %851 = vmatprep.subr.bf16.mxu1 %v955_v20 }
 0x243   :  { %852 = vmatpush3.bf16.msra.mxu1 %v382_v61 }
 0x244   :  { %865 = vmatprep.subr.bf16.mxu1 %v955_v20 }
 0x246   :  { %854 = vmatmul.mubr.msk.bf16.vlgmr.msra.gmra.mxu1 %vm257_vm1, %v377_v62 }
 0x247   :  { %867 = vmatprep.mubr.msk.bf16.mxu1 %vm956_vm2, %v955_v20 }
 0x306   :  { %v421_v4 = vpop.f32.mrf.mxu1 }
 0x308   :  { %v855_v5 = vpop.f32.mrf.mxu1 }
 0x30a   :  { %v424_v7 = vpop.f32.mrf.mxu1 }
 0x30b   :  { %v428_v8 = vpack.c.bf16 %v424_v7, %v421_v4 }
 0x30c   :  { %v856_v10 = vpop.f32.mrf.mxu1 }
 0x30d   :  { %862 = vmatmul.mubr.msk.bf16.vlgmr.msra.gmra.mxu0 %vm257_vm1, %v428_v8 }
 0x30e   :  { %873 = vmatprep.mubr.msk.bf16.mxu0 %vm956_vm2, %v955_v20 }
 0x3cd   :  { %v485_v21 = vpop.f32.mrf.mxu0 }
 0x3ce   :  { %v486_v6 = vadd.f32 %v786_v19, %v485_v21 }
 0x3cf   :  { %v863_v22 = vpop.f32.mrf.mxu0 }
 0x3d0   :  { %v492_v27 = vmax.f32 %v486_v6, 0.0 }
 0x3d1   :  { %v488_v2 = vpop.f32.mrf.mxu0 }
 0x3d2   :  { %v489_v24 = vadd.f32 %v786_v19, %v488_v2 }
 0x3d3   :  { %v864_v26 = vpop.f32.mrf.mxu0 }
 0x3d4   :  { %v493_v28 = vmax.f32 %v489_v24, 0.0  ;;  %v529_v29 = vpack.c.bf16 %v489_v24, %v486_v6 }
 0x3d6   :  { %v579_v31 = vpack.c.bf16 %v493_v28, %v492_v27  ;;  %866 = vmatpush3.bf16.msra.mxu1 %v529_v29 }
 0x3d7   :  { %877 = vmatprep.subr.bf16.mxu1 %v955_v20 }
 0x3d8   :  { %872 = vmatpush3.bf16.msra.mxu0 %v579_v31 }
 0x3d9   :  { %868 = vmatmul.mubr.msk.bf16.vlgmr.msra.gmra.mxu1 %vm530_vm15, %v524_v32  ;;  %885 = vmatprep.subr.bf16.mxu0 %v955_v20 }
 0x3da   :  { %878 = vmatpush3.bf16.msra.mxu1 %v926_v30  ;;  %881 = vmatprep.mubr.msk.bf16.mxu1 %vm956_vm2, %v955_v20 }
 0x3db   :  { %874 = vmatmul.mubr.msk.bf16.vlgmr.msra.gmra.mxu0 %vm530_vm15, %v524_v32  ;;  %879 = vmatprep.subr.bf16.mxu1 %v955_v20 }
 0x3dc   :  { %886 = vmatpush3.bf16.msra.mxu0 %v925_v33  ;;  %889 = vmatprep.mubr.msk.bf16.mxu0 %vm956_vm2, %v955_v20 }
 0x3dd   :  { %887 = vmatprep.subr.bf16.mxu0 %v955_v20 }
 0x3de   :  { %880 = vmatpush3.bf16.msra.mxu1 %v928_v35 }
 0x3e0   :  { %888 = vmatpush3.bf16.msra.mxu0 %v927_v34 }
 0x499   :  { %v568_v36 = vpop.f32.mrf.mxu1 }
 0x49a   :  { %v574_v37 = vpack.c.bf16 %v568_v36, %v568_v36 }
 0x49b   :  { %v869_v38 = vpop.f32.mrf.mxu1  ;;  %v614_v39 = vpop.f32.mrf.mxu0 }
 0x49c   :  { %v620_v40 = vpack.c.bf16 %v614_v39, %v614_v39  ;;  %890 = vmatmul.mubr.msk.bf16.vlgmr.msra.gmra.mxu0 %vm257_vm1, %v574_v37 }
 0x49d   :  { %v571_v41 = vpop.f32.mrf.mxu1  ;;  %v875_v42 = vpop.f32.mrf.mxu0 }
 0x49e   :  { %882 = vmatmul.mubr.msk.bf16.vlgmr.msra.gmra.mxu1 %vm257_vm1, %v620_v40 }
 0x49f   :  { %v870_v20 = vpop.f32.mrf.mxu1  ;;  %v617_v43 = vpop.f32.mrf.mxu0 }
 0x4a1   :  { %v876_v44 = vpop.f32.mrf.mxu0 }
 0x55c   :  { %v725_v45 = vpop.f32.mrf.mxu0 }
 0x55e   :  { %v670_v46 = vpop.f32.mrf.mxu1  ;;  %v891_v47 = vpop.f32.mrf.mxu0 }
 0x55f   :  { %v726_v49 = vadd.f32 %v725_v45, %v670_v46 }
 0x560   :  { %v883_v50 = vpop.f32.mrf.mxu1  ;;  %v728_v51 = vpop.f32.mrf.mxu0 }
 0x561   :  { %v738_v52 = vadd.f32 %v802_v48, %v726_v49 }
 0x562   :  { %v673_v53 = vpop.f32.mrf.mxu1  ;;  %v892_v54 = vpop.f32.mrf.mxu0 }
 0x563   :  { %739 = vst [vmem:[#allocation2] sm:$0xff] %v738_v52 }
 0x564   :  { %v884_v55 = vpop.f32.mrf.mxu1 }
 0x565   :  { %940 = shalt.err (!%p937_p4)
}
 0x566   :  { %749 = dma.vmem_to_hbm [thread:$0]  %s747_s0, 128, %s1217_s11, [#allocation3]  }
 0x567   :  { %949 = dma.done.wait [#allocation3], 128  }
 0x568   :  { %950 = vsyncadd [#allocation3], 4294967168 }
 0x569   :  { %753 = vsyncpa [#allocation3], 1 }

</bundles_post_ra>
